<compile_context>
chip_gen: v5e
topology: v5e:2x2
jax: 0.10.0
libtpu: 0.0.40
codegen_flags: <defaults>
</compile_context>

<pallas_src>
import functools

import jax
import jax.numpy as jnp
from jax import lax
from jax.experimental import pallas as pl
from jax.experimental.pallas import tpu as pltpu

_HIDDEN = 256  # per-head hidden width (fixed by the PyTorch module)


def _round_up(x, m):
    return (x + m - 1) // m * m


def _block_diag(a, b):
    """[[a, 0], [0, b]]  with zeros in the off-diagonal blocks."""
    top = jnp.concatenate([a, jnp.zeros((a.shape[0], b.shape[1]), a.dtype)], axis=1)
    bot = jnp.concatenate([jnp.zeros((b.shape[0], a.shape[1]), b.dtype), b], axis=1)
    return jnp.concatenate([top, bot], axis=0)


def _mm_decoder_kernel(x_ref, w1_ref, b1_ref, w2_ref, b2_ref, w3_ref, b3_ref,
                       out_ref, *, sub):
    # x: (TILE_N, D) f32 ; weights bf16 ; biases f32 ; out bf16 (TILE_N, 128).
    # Sub-block the row tile so the (sub, 512) f32 layer-1 activation stays in
    # vregs (sub=64 -> 128 KiB, half the vreg file) instead of spilling.
    nsub = x_ref.shape[0] // sub

    def body(s, carry):
        r = pl.multiple_of(s * sub, sub)

        # in-kernel f32 -> bf16 cast of the activations (MXU-native operand)
        x = x_ref[pl.ds(r, sub), :].astype(jnp.bfloat16)

        # layer 1 (both heads fused along the matmul's output axis)
        h = jnp.dot(x, w1_ref[...], preferred_element_type=jnp.float32) + b1_ref[...]
        h = jnp.maximum(h, 0.0)

        # layer 2 (block-diagonal -> the two heads stay independent)
        h2 = jnp.dot(h.astype(jnp.bfloat16), w2_ref[...],
                     preferred_element_type=jnp.float32) + b2_ref[...]
        h2 = jnp.maximum(h2, 0.0)

        # layer 3 (block-diagonal, zero-padded to a lane-dense 128-wide output)
        o = jnp.dot(h2.astype(jnp.bfloat16), w3_ref[...],
                    preferred_element_type=jnp.float32) + b3_ref[...]
        out_ref[pl.ds(r, sub), :] = o.astype(out_ref.dtype)
        return carry

    lax.fori_loop(0, nsub, body, None, unroll=True)


def fuse_params(params, future_steps):
    """Build the fused (and lane-padded) weights once, outside the per-call path."""
    (lw1, lb1, lw2, lb2, lw3, lb3, pw1, pb1, pw2, pb2, pw3, pb3) = params

    w1 = jnp.concatenate([lw1, pw1], axis=1)          # (D, 512)
    b1 = jnp.concatenate([lb1, pb1], axis=1)          # (1, 512)
    w2 = _block_diag(lw2, pw2)                        # (512, 2D)
    b2 = jnp.concatenate([lb2, pb2], axis=1)          # (1, 2D)
    w3 = _block_diag(lw3, pw3)                        # (2D, 2F+1)
    b3 = jnp.concatenate([lb3, pb3], axis=1)          # (1, 2F+1)

    out_cols = future_steps * 2 + 1
    out_pad = _round_up(max(out_cols, 128), 128)      # lane-dense output width
    w3 = jnp.pad(w3, ((0, 0), (0, out_pad - out_cols)))
    b3 = jnp.pad(b3, ((0, 0), (0, out_pad - out_cols)))

    # bf16 matmul operands (MXU native); f32 biases (added after f32 accumulation)
    return (w1.astype(jnp.bfloat16), b1.astype(jnp.float32),
            w2.astype(jnp.bfloat16), b2.astype(jnp.float32),
            w3.astype(jnp.bfloat16), b3.astype(jnp.float32))


def _choose_row_tiles(n_rows, tile_n):
    """Pick (grid row tile, inner sub-block) for n_rows (already >= 8)."""
    if n_rows >= 64:
        tn = min(_round_up(tile_n, 64), (n_rows // 64) * 64)
    else:
        tn = (n_rows // 8) * 8

    # v7x shards the "parallel" grid axis over 2 TensorCores: keep >=2 (ideally
    # >=4) grid steps whenever the row count allows. (No effect on v5e/v6e.)
    want_steps = 4 if n_rows >= 256 else 2
    while n_rows >= 16 and pl.cdiv(n_rows, tn) < want_steps and tn > 8:
        tn = max(8, _round_up(pl.cdiv(tn, 2), 8))
        if tn == 8:
            break

    # Largest sub-block (<=64 rows) that divides the tile: 64x512 f32 = 128 KiB,
    # half the vreg file, so the chain's intermediates avoid VMEM spills.
    sub = tn
    for cand in (64, 32, 16, 8):
        if tn % cand == 0:
            sub = cand
            break
    return tn, sub


@functools.partial(jax.jit,
                   static_argnames=("k", "future_steps", "tile_n", "out_dtype"))
def multimodal_decoder_pallas(x, fused_params, *, k, future_steps,
                              tile_n=1024, out_dtype=jnp.bfloat16):
    """x: (..., embed_dim).  Returns (loc: (-1, k, future_steps, 2), pi: x.shape[:-1])."""
    embed_dim = x.shape[-1]
    lead_shape = x.shape[:-1]
    w1, b1, w2, b2, w3, b3 = fused_params
    out_pad = w3.shape[1]              # 128 (lane-dense)
    n_loc = future_steps * 2
    h1 = w1.shape[1]
    two_d = w2.shape[1]

    x2d = x.reshape(-1, embed_dim)     # keep original dtype; cast in-kernel
    n = x2d.shape[0]

    # Only pad when there are fewer than 8 rows (sublane minimum). For larger N
    # the ragged tail is a partial last block handled by Pallas (masked writes).
    if n < 8:
        x2d = jnp.pad(x2d, ((0, 8 - n), (0, 0)))
    n_rows = x2d.shape[0]

    tn, sub = _choose_row_tiles(n_rows, tile_n)
    grid = (pl.cdiv(n_rows, tn),)

    row_spec = lambda cols: pl.BlockSpec((tn, cols), lambda i: (i, 0))
    const_spec = lambda a: pl.BlockSpec(a.shape, lambda i: (0, 0))

    flops = 2 * n_rows * (embed_dim * h1 + h1 * two_d + two_d * out_pad)
    bytes_accessed = (int(x2d.size) * x2d.dtype.itemsize
                      + sum(int(a.size) * a.dtype.itemsize
                            for a in (w1, b1, w2, b2, w3, b3))
                      + n_rows * out_pad * jnp.dtype(out_dtype).itemsize)

    out = pl.pallas_call(
        functools.partial(_mm_decoder_kernel, sub=sub),
        out_shape=jax.ShapeDtypeStruct((n_rows, out_pad), out_dtype),
        grid=grid,
        in_specs=[
            row_spec(embed_dim),
            const_spec(w1), const_spec(b1),
            const_spec(w2), const_spec(b2),
            const_spec(w3), const_spec(b3),
        ],
        out_specs=row_spec(out_pad),
        compiler_params=pltpu.CompilerParams(
            dimension_semantics=("parallel",)),
        cost_estimate=pl.CostEstimate(
            flops=int(flops), transcendentals=0,
            bytes_accessed=int(bytes_accessed)),
    )(x2d, w1, b1, w2, b2, w3, b3)

    # Slice loc / pi directly out of the kernel output (no out[:n] copy of the
    # whole padded slab); each consumer only reads the columns it needs.
    # TODO(synk): outputs are bf16 (matmul precision is already bf16-bounded);
    # cast downstream if f32 is required.
    loc = out[:n, :n_loc].reshape(-1, k, future_steps, 2)
    pi = out[:n, n_loc].reshape(lead_shape)
    return loc, pi


def init_params(key, embed_dim, future_steps):
    """Per-head params, weights stored (in_features, out_features) like x @ W + b."""
    ks = jax.random.split(key, 12)

    def lin(kw, kb, fan_in, fan_out):
        bound = 1.0 / jnp.sqrt(fan_in)
        w = jax.random.uniform(kw, (fan_in, fan_out), jnp.float32, -bound, bound)
        b = jax.random.uniform(kb, (1, fan_out), jnp.float32, -bound, bound)
        return w, b

    lw1, lb1 = lin(ks[0], ks[1], embed_dim, _HIDDEN)
    lw2, lb2 = lin(ks[2], ks[3], _HIDDEN, embed_dim)
    lw3, lb3 = lin(ks[4], ks[5], embed_dim, future_steps * 2)
    pw1, pb1 = lin(ks[6], ks[7], embed_dim, _HIDDEN)
    pw2, pb2 = lin(ks[8], ks[9], _HIDDEN, embed_dim)
    pw3, pb3 = lin(ks[10], ks[11], embed_dim, 1)
    return (lw1, lb1, lw2, lb2, lw3, lb3, pw1, pb1, pw2, pb2, pw3, pb3)


def reference_forward(x, params, *, k, future_steps):
    """Pure-JAX reference (same bf16 matmul inputs / f32 accumulation as the kernel)."""
    (lw1, lb1, lw2, lb2, lw3, lb3, pw1, pb1, pw2, pb2, pw3, pb3) = params
    x2d = x.reshape(-1, x.shape[-1])

    def mm(a, w):
        return jnp.dot(a.astype(jnp.bfloat16), w.astype(jnp.bfloat16),
                       preferred_element_type=jnp.float32)

    h = jnp.maximum(mm(x2d, lw1) + lb1, 0.0)
    h = jnp.maximum(mm(h, lw2) + lb2, 0.0)
    loc = (mm(h, lw3) + lb3).reshape(-1, k, future_steps, 2)
    g = jnp.maximum(mm(x2d, pw1) + pb1, 0.0)
    g = jnp.maximum(mm(g, pw2) + pb2, 0.0)
    pi = (mm(g, pw3) + pb3).reshape(x.shape[:-1])
    return loc, pi


if __name__ == "__main__":
    embed_dim = 32
    future_steps = 8
    k = 4
    batch = 2

    key = jax.random.PRNGKey(0)
    kx, kp = jax.random.split(key)

    # x: (batch, k, embed_dim) — one embedding per trajectory mode.
    x = jax.random.normal(kx, (batch, k, embed_dim), dtype=jnp.float32)
    params = init_params(kp, embed_dim, future_steps)
    fused = fuse_params(params, future_steps)

    loc, pi = multimodal_decoder_pallas(x, fused, k=k, future_steps=future_steps)
    loc, pi = jax.block_until_ready((loc, pi))

    # sanity check against pure-JAX reference (kernel output is bf16)
    loc_ref, pi_ref = reference_forward(x, params, k=k, future_steps=future_steps)
    assert loc.shape == (batch, k, future_steps, 2), loc.shape
    assert pi.shape == (batch, k), pi.shape
    assert jnp.allclose(loc.astype(jnp.float32), loc_ref, atol=2e-2, rtol=2e-2)
    assert jnp.allclose(pi.astype(jnp.float32), pi_ref, atol=2e-2, rtol=2e-2)

    print("KERNEL_OK")
</pallas_src>

<mosaic_0001>
module attributes {stable_mosaic.version = 11 : i64} {
  func.func @_mm_decoder_kernel(%arg0: i32, %arg1: memref<8x32xf32, #tpu.memory_space<vmem>>, %arg2: memref<32x512xbf16, #tpu.memory_space<vmem>>, %arg3: memref<1x512xf32, #tpu.memory_space<vmem>>, %arg4: memref<512x64xbf16, #tpu.memory_space<vmem>>, %arg5: memref<1x64xf32, #tpu.memory_space<vmem>>, %arg6: memref<64x128xbf16, #tpu.memory_space<vmem>>, %arg7: memref<1x128xf32, #tpu.memory_space<vmem>>, %arg8: memref<8x128xbf16, #tpu.memory_space<vmem>>) attributes {dimension_semantics = [#tpu.dimension_semantics<parallel>], iteration_bounds = array<i64: 1>, scalar_prefetch = 0 : i64, scratch_operands = 0 : i64, tpu.core_type = #tpu.core_type<tc>, window_params = [{transform_indices = @transform_0, window_bounds = array<i64: 8, 32>}, {pipeline_mode = #tpu.pipeline_mode<synchronous>, transform_indices = @transform_1, window_bounds = array<i64: 32, 512>}, {pipeline_mode = #tpu.pipeline_mode<synchronous>, transform_indices = @transform_2, window_bounds = array<i64: 1, 512>}, {pipeline_mode = #tpu.pipeline_mode<synchronous>, transform_indices = @transform_3, window_bounds = array<i64: 512, 64>}, {pipeline_mode = #tpu.pipeline_mode<synchronous>, transform_indices = @transform_4, window_bounds = array<i64: 1, 64>}, {pipeline_mode = #tpu.pipeline_mode<synchronous>, transform_indices = @transform_5, window_bounds = array<i64: 64, 128>}, {pipeline_mode = #tpu.pipeline_mode<synchronous>, transform_indices = @transform_6, window_bounds = array<i64: 1, 128>}, {transform_indices = @transform_7, window_bounds = array<i64: 8, 128>}]} {
    %c0_i32 = arith.constant 0 : i32
    %c8_i32 = arith.constant 8 : i32
    %0 = arith.muli %c0_i32, %c8_i32 : i32
    %1 = tpu.assume_multiple %0, 8 : i32
    %2 = arith.index_cast %1 : i32 to index
    %c0 = arith.constant 0 : index
    %3 = vector.load %arg1[%2, %c0] : memref<8x32xf32, #tpu.memory_space<vmem>>, vector<8x32xf32>
    %4 = arith.truncf %3 : vector<8x32xf32> to vector<8x32xbf16>
    %c0_0 = arith.constant 0 : index
    %c0_1 = arith.constant 0 : index
    %5 = vector.load %arg2[%c0_0, %c0_1] : memref<32x512xbf16, #tpu.memory_space<vmem>>, vector<32x512xbf16>
    %cst = arith.constant dense<0.000000e+00> : vector<8x512xf32>
    %6 = tpu.matmul %4, %5, %cst {dimension_numbers = #tpu.dot_dimension_numbers<[1], [0], [0], [1], [0, 0, 1, 1], [], []>} : vector<8x32xbf16>, vector<32x512xbf16>, vector<8x512xf32> -> vector<8x512xf32>
    %c0_2 = arith.constant 0 : index
    %c0_3 = arith.constant 0 : index
    %7 = vector.load %arg3[%c0_2, %c0_3] : memref<1x512xf32, #tpu.memory_space<vmem>>, vector<1x512xf32>
    %8 = vector.broadcast %7 : vector<1x512xf32> to vector<8x512xf32>
    %9 = arith.addf %6, %8 : vector<8x512xf32>
    %cst_4 = arith.constant 0.000000e+00 : f32
    %10 = vector.broadcast %cst_4 : f32 to vector<8x512xf32>
    %11 = arith.maximumf %9, %10 : vector<8x512xf32>
    %12 = arith.truncf %11 : vector<8x512xf32> to vector<8x512xbf16>
    %c0_5 = arith.constant 0 : index
    %c0_6 = arith.constant 0 : index
    %13 = vector.load %arg4[%c0_5, %c0_6] : memref<512x64xbf16, #tpu.memory_space<vmem>>, vector<512x64xbf16>
    %cst_7 = arith.constant dense<0.000000e+00> : vector<8x64xf32>
    %14 = tpu.matmul %12, %13, %cst_7 {dimension_numbers = #tpu.dot_dimension_numbers<[1], [0], [0], [1], [0, 0, 1, 1], [], []>} : vector<8x512xbf16>, vector<512x64xbf16>, vector<8x64xf32> -> vector<8x64xf32>
    %c0_8 = arith.constant 0 : index
    %c0_9 = arith.constant 0 : index
    %15 = vector.load %arg5[%c0_8, %c0_9] : memref<1x64xf32, #tpu.memory_space<vmem>>, vector<1x64xf32>
    %16 = vector.broadcast %15 : vector<1x64xf32> to vector<8x64xf32>
    %17 = arith.addf %14, %16 : vector<8x64xf32>
    %cst_10 = arith.constant 0.000000e+00 : f32
    %18 = vector.broadcast %cst_10 : f32 to vector<8x64xf32>
    %19 = arith.maximumf %17, %18 : vector<8x64xf32>
    %20 = arith.truncf %19 : vector<8x64xf32> to vector<8x64xbf16>
    %c0_11 = arith.constant 0 : index
    %c0_12 = arith.constant 0 : index
    %21 = vector.load %arg6[%c0_11, %c0_12] : memref<64x128xbf16, #tpu.memory_space<vmem>>, vector<64x128xbf16>
    %cst_13 = arith.constant dense<0.000000e+00> : vector<8x128xf32>
    %22 = tpu.matmul %20, %21, %cst_13 {dimension_numbers = #tpu.dot_dimension_numbers<[1], [0], [0], [1], [0, 0, 1, 1], [], []>} : vector<8x64xbf16>, vector<64x128xbf16>, vector<8x128xf32> -> vector<8x128xf32>
    %c0_14 = arith.constant 0 : index
    %c0_15 = arith.constant 0 : index
    %23 = vector.load %arg7[%c0_14, %c0_15] : memref<1x128xf32, #tpu.memory_space<vmem>>, vector<1x128xf32>
    %24 = vector.broadcast %23 : vector<1x128xf32> to vector<8x128xf32>
    %25 = arith.addf %22, %24 : vector<8x128xf32>
    %26 = arith.truncf %25 : vector<8x128xf32> to vector<8x128xbf16>
    %27 = arith.index_cast %1 : i32 to index
    %c0_16 = arith.constant 0 : index
    %28 = vector.load %arg8[%27, %c0_16] : memref<8x128xbf16, #tpu.memory_space<vmem>>, vector<8x128xbf16>
    tpu.vector_store %arg8[%27, %c0_16], %26 {strides = array<i32>} : memref<8x128xbf16, #tpu.memory_space<vmem>>, vector<8x128xbf16>,
    %c1_i32 = arith.constant 1 : i32
    return
  }
  func.func @transform_0(%arg0: i32) -> (i32, i32) {
    %c0_i32 = arith.constant 0 : i32
    %c0_i32_0 = arith.constant 0 : i32
    return %arg0, %c0_i32 : i32, i32
  }
  func.func @transform_1(%arg0: i32) -> (i32, i32) {
    %c0_i32 = arith.constant 0 : i32
    %c0_i32_0 = arith.constant 0 : i32
    %c0_i32_1 = arith.constant 0 : i32
    return %c0_i32, %c0_i32_0 : i32, i32
  }
  func.func @transform_2(%arg0: i32) -> (i32, i32) {
    %c0_i32 = arith.constant 0 : i32
    %c0_i32_0 = arith.constant 0 : i32
    %c0_i32_1 = arith.constant 0 : i32
    return %c0_i32, %c0_i32_0 : i32, i32
  }
  func.func @transform_3(%arg0: i32) -> (i32, i32) {
    %c0_i32 = arith.constant 0 : i32
    %c0_i32_0 = arith.constant 0 : i32
    %c0_i32_1 = arith.constant 0 : i32
    return %c0_i32, %c0_i32_0 : i32, i32
  }
  func.func @transform_4(%arg0: i32) -> (i32, i32) {
    %c0_i32 = arith.constant 0 : i32
    %c0_i32_0 = arith.constant 0 : i32
    %c0_i32_1 = arith.constant 0 : i32
    return %c0_i32, %c0_i32_0 : i32, i32
  }
  func.func @transform_5(%arg0: i32) -> (i32, i32) {
    %c0_i32 = arith.constant 0 : i32
    %c0_i32_0 = arith.constant 0 : i32
    %c0_i32_1 = arith.constant 0 : i32
    return %c0_i32, %c0_i32_0 : i32, i32
  }
  func.func @transform_6(%arg0: i32) -> (i32, i32) {
    %c0_i32 = arith.constant 0 : i32
    %c0_i32_0 = arith.constant 0 : i32
    %c0_i32_1 = arith.constant 0 : i32
    return %c0_i32, %c0_i32_0 : i32, i32
  }
  func.func @transform_7(%arg0: i32) -> (i32, i32) {
    %c0_i32 = arith.constant 0 : i32
    %c0_i32_0 = arith.constant 0 : i32
    return %arg0, %c0_i32 : i32, i32
  }
}

</mosaic_0001>

<bundles_post_ra>
// kernel: squeeze.1
= control target key start
LH: loop header
LB: loop body
LE: loop exit
PB: predicated region body
PF: predicated region fallthrough
CT: control target
= control target key end

     0   :  { %s92_s0 = inlined_call_operand.vmem [shape: bf16[8], index: 0, kind: input, shape index: {}]   ;;  %s93_s1 = inlined_call_operand.hbm [shape: bf16[2,4], index: 1, kind: output, shape index: {}]  }
   0x1   :  { %v14_v0 = vld [vmem:[%s92_s0] sm:$0x1] }
   0x2   :  { %2 = vsyncpa [#allocation1], 0  ;;  %v15_v1 = vunpack.c.l.bf16 %v14_v0  ;;  %vm19_vm0 = vcmask 31744   ;;  %s74_s0 = smov 124   ;;  %s75_s8 = smov [#allocation0]  }
   0x3   :  { %s37_s9 = sshll.u32 %s75_s8, 4  ;;  %s39_s1 = sshll.u32 %s93_s1, 4  ;;  %s38_s9 = int_to_ptr.vmem [resolvable:$true] %s37_s9  ;;  %s40_s1 = int_to_ptr.hbm [resolvable:$true] %s39_s1 }
   0x4   :  { %17 = vst [vmem:[#allocation3] sm:$0x3] %v15_v1 }
   0xb   :  { %v21_v2 = vld [vmem:[#allocation3] sm:$0x1]  }
   0xc   :  { %v18_v3 = vld [vmem:[#allocation3] sm:$0x1]   ;;  %22 = vrot.lane.b32.xlu0 %v21_v2, %s74_s0 }
   0xd   :  { %20 = vst.msk [vmem:[#allocation2] sm:$0x1] %vm19_vm0, %v18_v3  }
  0x7e   :  { %v23_v4 = vpop.permute.xlu0 %22  }
  0x7f   :  { %26 = vst.msk [vmem:[#allocation2 + $0x1] sm:$0x1] %vm19_vm0, %v23_v4  }
  0x86   :  { %v29_v5 = vld [vmem:[#allocation2] sm:$0x3] }
  0x87   :  { %v30_v6 = vpack.c.bf16 0.0, %v29_v5 }
  0x89   :  { %33 = vst [vmem:[#allocation0] sm:$0x1] %v30_v6 }
  0x8a   :  { %42 = dma.vmem_to_hbm [thread:$0]  %s38_s9, 16, %s40_s1, [#allocation1]  }
  0x8b   :  { %72 = dma.done.wait [#allocation1], 16  }
  0x8c   :  { %73 = vsyncadd [#allocation1], 4294967280 }
  0x8d   :  { %45 = vsyncpa [#allocation1], 1 }

// kernel: multimodal_decoder_pallas.1
= control target key start
LH: loop header
LB: loop body
LE: loop exit
PB: predicated region body
PF: predicated region fallthrough
CT: control target
= control target key end

     0   :  { %vm87_vm0 = vcmask 261120   ;;  %vm501_vm1 = vcmask 523264   ;;  %s962_s1 = inlined_call_operand.vmem [shape: bf16[32,512], index: 1, kind: input, shape index: {}]   ;;  %s963_s0 = inlined_call_operand.vmem [shape: f32[8,32], index: 0, kind: input, shape index: {}]   ;;  %s964_s3 = inlined_call_operand.vmem [shape: bf16[512,64], index: 3, kind: input, shape index: {}]   ;;  %s965_s4 = inlined_call_operand.vmem [shape: f32[1,64], index: 4, kind: input, shape index: {}]   ;;  %s966_s2 = inlined_call_operand.vmem [shape: f32[1,512], index: 2, kind: input, shape index: {}]   ;;  %s967_s6 = inlined_call_operand.vmem [shape: f32[1,128], index: 6, kind: input, shape index: {}]   ;;  %s968_s5 = inlined_call_operand.vmem [shape: bf16[64,128], index: 5, kind: input, shape index: {}]   ;;  %s969_s7 = inlined_call_operand.vmem [shape: bf16[8,128], index: 7, kind: output, shape index: {}]  }
   0x1   :  { %v542_v0 = vld [vmem:[%s962_s1 + $0x20] sm:$0xf]  ;;  %v711_v1 = vld [vmem:[%s962_s1 + $0x2c] sm:$0xf0]  ;;  %v550_v2 = vld [vmem:[%s962_s1 + $0x28] sm:$0xf] }
   0x2   :  { %v543_v3 = vor.u32 %v711_v1, %v542_v0  ;;  %v712_v4 = vld [vmem:[%s962_s1 + $0x34] sm:$0xf0]  ;;  %v710_v5 = vld [vmem:[%s962_s1 + $0x2c] sm:$0xf]  ;;  %v552_v6 = vld [vmem:[%s962_s1 + $0x38] sm:$0xf0] }
   0x3   :  { %v551_v7 = vor.u32 %v712_v4, %v550_v2  ;;  %v555_v8 = vor.u32 %v710_v5, %v552_v6  ;;  %v709_v9 = vld [vmem:[%s962_s1 + $0x24] sm:$0xf]  ;;  %v544_v10 = vld [vmem:[%s962_s1 + $0x30] sm:$0xf0]  ;;  %v526_v11 = vld [vmem:[%s962_s1] sm:$0xf] }
   0x4   :  { %97 = vmatpush.bf16.msra.mxu0 %v543_v3  ;;  %v547_v12 = vor.u32 %v709_v9, %v544_v10  ;;  %v707_v13 = vld [vmem:[%s962_s1 + $0xc] sm:$0xf0]  ;;  %v534_v14 = vld [vmem:[%s962_s1 + $0x8] sm:$0xf]  ;;  %v708_v15 = vld [vmem:[%s962_s1 + $0x14] sm:$0xf0] }
   0x5   :  { %123 = vmatpush.bf16.msra.mxu2 %v551_v7  ;;  %136 = vmatpush.bf16.msra.mxu3 %v555_v8  ;;  %v527_v16 = vor.u32 %v707_v13, %v526_v11  ;;  %v535_v17 = vor.u32 %v708_v15, %v534_v14  ;;  %v706_v18 = vld [vmem:[%s962_s1 + $0xc] sm:$0xf]  ;;  %v536_v19 = vld [vmem:[%s962_s1 + $0x18] sm:$0xf0]  ;;  %v705_v20 = vld [vmem:[%s962_s1 + $0x4] sm:$0xf] }
   0x6   :  { %110 = vmatpush.bf16.msra.mxu1 %v547_v12  ;;  %v539_v21 = vor.u32 %v706_v18, %v536_v19  ;;  %v528_v22 = vld [vmem:[%s962_s1 + $0x10] sm:$0xf0]  ;;  %v27_v23 = vld [vmem:[%s963_s0] sm:$0xff]  ;;  %v720_v24 = vld [vmem:[%s964_s3 + $0x38] sm:$0xff] }
   0x7   :  { %v531_v25 = vor.u32 %v705_v20, %v528_v22  ;;  %v28_v26 = vpack.c.bf16 %v27_v23, %v27_v23  ;;  %v728_v27 = vld [vmem:[%s964_s3 + $0x78] sm:$0xff]  ;;  %v719_v29 = vld [vmem:[%s964_s3 + $0x30] sm:$0xff]  ;;  %v718_v33 = vld [vmem:[%s964_s3 + $0x28] sm:$0xff] }
   0x8   :  { %98 = vmatpush.bf16.msra.mxu0 %v527_v16  ;;  %v736_v28 = vld [vmem:[%s964_s3 + $0xb8] sm:$0xff]  ;;  %v727_v31 = vld [vmem:[%s964_s3 + $0x70] sm:$0xff]  ;;  %v726_v35 = vld [vmem:[%s964_s3 + $0x68] sm:$0xff] }
   0x9   :  { %124 = vmatpush.bf16.msra.mxu2 %v535_v17  ;;  %137 = vmatpush.bf16.msra.mxu3 %v539_v21  ;;  %v744_v30 = vld [vmem:[%s964_s3 + $0xf8] sm:$0xff]  ;;  %v735_v32 = vld [vmem:[%s964_s3 + $0xb0] sm:$0xff]  ;;  %v734_v36 = vld [vmem:[%s964_s3 + $0xa8] sm:$0xff] }
   0xa   :  { %111 = vmatpush.bf16.msra.mxu1 %v531_v25  ;;  %v743_v34 = vld [vmem:[%s964_s3 + $0xf0] sm:$0xff]  ;;  %v717_v37 = vld [vmem:[%s964_s3 + $0x20] sm:$0xff]  ;;  %v742_v38 = vld [vmem:[%s964_s3 + $0xe8] sm:$0xff] }
   0xb   :  { %556 = vmatmul.msk.bf16.vlgmr.msra.gmra.mxu0 %vm87_vm0, %v28_v26  ;;  %v725_v39 = vld [vmem:[%s964_s3 + $0x60] sm:$0xff]  ;;  %v716_v41 = vld [vmem:[%s964_s3 + $0x18] sm:$0xff]  ;;  %v715_v45 = vld [vmem:[%s964_s3 + $0x10] sm:$0xff] }
   0xc   :  { %411 = vmatpush.bf16.msrb.mxu0 %v720_v24  ;;  %558 = vmatmul.msk.bf16.vlgmr.msra.gmra.mxu2 %vm87_vm0, %v28_v26  ;;  %v733_v40 = vld [vmem:[%s964_s3 + $0xa0] sm:$0xff]  ;;  %v724_v43 = vld [vmem:[%s964_s3 + $0x58] sm:$0xff]  ;;  %v723_v47 = vld [vmem:[%s964_s3 + $0x50] sm:$0xff] }
   0xd   :  { %559 = vmatmul.msk.bf16.vlgmr.msra.gmra.mxu3 %vm87_vm0, %v28_v26  ;;  %557 = vmatmul.msk.bf16.vlgmr.msra.gmra.mxu1 %vm87_vm0, %v28_v26  ;;  %v741_v42 = vld [vmem:[%s964_s3 + $0xe0] sm:$0xff]  ;;  %v732_v44 = vld [vmem:[%s964_s3 + $0x98] sm:$0xff]  ;;  %v714_v48 = vld [vmem:[%s964_s3 + $0x8] sm:$0xff] }
   0xe   :  { %424 = vmatpush.bf16.msrb.mxu1 %v728_v27  ;;  %437 = vmatpush.bf16.msrb.mxu2 %v736_v28  ;;  %v740_v46 = vld [vmem:[%s964_s3 + $0xd8] sm:$0xff]  ;;  %v722_v49 = vld [vmem:[%s964_s3 + $0x48] sm:$0xff]  ;;  %v731_v50 = vld [vmem:[%s964_s3 + $0x90] sm:$0xff] }
   0xf   :  { %450 = vmatpush.bf16.msrb.mxu3 %v744_v30  ;;  %v739_v51 = vld [vmem:[%s964_s3 + $0xd0] sm:$0xff]  ;;  %v713_v52 = vld [vmem:[%s964_s3] sm:$0xff]  ;;  %v730_v54 = vld [vmem:[%s964_s3 + $0x88] sm:$0xff] }
  0x10   :  { %412 = vmatpush.bf16.msrb.mxu0 %v719_v29  ;;  %v721_v53 = vld [vmem:[%s964_s3 + $0x40] sm:$0xff]  ;;  %v738_v55 = vld [vmem:[%s964_s3 + $0xc8] sm:$0xff]  ;;  %v748_v19 = vld [vmem:[%s968_s5 + $0x18] sm:$0xff] }
  0x11   :  { %v729_v56 = vld [vmem:[%s964_s3 + $0x80] sm:$0xff]  ;;  %v747_v20 = vld [vmem:[%s968_s5 + $0x10] sm:$0xff]  ;;  %v746_v21 = vld [vmem:[%s968_s5 + $0x8] sm:$0xff] }
  0x12   :  { %425 = vmatpush.bf16.msrb.mxu1 %v727_v31  ;;  %438 = vmatpush.bf16.msrb.mxu2 %v735_v32  ;;  %v737_v57 = vld [vmem:[%s964_s3 + $0xc0] sm:$0xff] }
  0x13   :  { %451 = vmatpush.bf16.msrb.mxu3 %v743_v34  ;;  %v37_v58 = vld [vmem:[%s966_s2] sm:$0xf] }
  0x14   :  { %413 = vmatpush.bf16.msrb.mxu0 %v718_v33  ;;  %v39_v59 = vperm.slane %v37_v58, 0  ;;  %v40_v60 = vperm.slane %v37_v58, 1  ;;  %v41_v2 = vperm.slane %v37_v58, 2  ;;  %v42_v3 = vperm.slane %v37_v58, 3  ;;  %v745_v22 = vld [vmem:[%s968_s5] sm:$0xff] }
  0x15   :  { %v749_v24 = vld [vmem:[%s965_s4] ss:$0 sm:$0xff] }
  0x16   :  { %426 = vmatpush.bf16.msrb.mxu1 %v726_v35  ;;  %439 = vmatpush.bf16.msrb.mxu2 %v734_v36 }
  0x17   :  { %452 = vmatpush.bf16.msrb.mxu3 %v742_v38  ;;  %v750_v38 = vld [vmem:[%s967_s6] ss:$0 sm:$0xff] }
  0x18   :  { %414 = vmatpush.bf16.msrb.mxu0 %v717_v37 }
  0x1a   :  { %427 = vmatpush.bf16.msrb.mxu1 %v725_v39  ;;  %440 = vmatpush.bf16.msrb.mxu2 %v733_v40 }
  0x1b   :  { %453 = vmatpush.bf16.msrb.mxu3 %v741_v42 }
  0x1c   :  { %415 = vmatpush.bf16.msrb.mxu0 %v716_v41 }
  0x1e   :  { %428 = vmatpush.bf16.msrb.mxu1 %v724_v43  ;;  %441 = vmatpush.bf16.msrb.mxu2 %v732_v44 }
  0x1f   :  { %454 = vmatpush.bf16.msrb.mxu3 %v740_v46 }
  0x20   :  { %416 = vmatpush.bf16.msrb.mxu0 %v715_v45 }
  0x22   :  { %429 = vmatpush.bf16.msrb.mxu1 %v723_v47  ;;  %442 = vmatpush.bf16.msrb.mxu2 %v731_v50 }
  0x23   :  { %455 = vmatpush.bf16.msrb.mxu3 %v739_v51 }
  0x24   :  { %417 = vmatpush.bf16.msrb.mxu0 %v714_v48 }
  0x26   :  { %430 = vmatpush.bf16.msrb.mxu1 %v722_v49  ;;  %443 = vmatpush.bf16.msrb.mxu2 %v730_v54 }
  0x27   :  { %456 = vmatpush.bf16.msrb.mxu3 %v738_v55 }
  0x28   :  { %418 = vmatpush.bf16.msrb.mxu0 %v713_v52 }
  0x2a   :  { %431 = vmatpush.bf16.msrb.mxu1 %v721_v53  ;;  %444 = vmatpush.bf16.msrb.mxu2 %v729_v56 }
  0x2b   :  { %457 = vmatpush.bf16.msrb.mxu3 %v737_v57 }
  0x2c   :  { %509 = vmatpush.bf16.msra.mxu0 %v748_v19 }
  0x30   :  { %510 = vmatpush.bf16.msra.mxu0 %v747_v20 }
  0x34   :  { %511 = vmatpush.bf16.msra.mxu0 %v746_v21 }
  0x38   :  { %512 = vmatpush.bf16.msra.mxu0 %v745_v22 }
  0x88   :  { %v100_v61 = vpop.f32.mrf.mxu0 }
  0x89   :  { %v101_v62 = vadd.f32 %v100_v61, %v39_v59 }
  0x8a   :  { %v113_v63 = vpop.f32.mrf.mxu1 }
  0x8b   :  { %v143_v0 = vmax.f32 %v101_v62, 0.0  ;;  %v114_v1 = vadd.f32 %v113_v63, %v40_v60 }
  0x8d   :  { %v147_v4 = vpack.c.bf16 %v143_v0, %v143_v0  ;;  %v144_v5 = vmax.f32 %v114_v1, 0.0 }
  0x8f   :  { %v148_v6 = vpack.c.bf16 %v144_v5, %v144_v5  ;;  %v126_v7 = vpop.f32.mrf.mxu2  ;;  %419 = vmatmul.bf16.vlgmr.msrb.gmra.mxu0 %v147_v4 }
  0x90   :  { %v139_v8 = vpop.f32.mrf.mxu3  ;;  %v127_v9 = vadd.f32 %v126_v7, %v41_v2  ;;  %v102_v11 = vpop.f32.mrf.mxu0 }
  0x91   :  { %v140_v10 = vadd.f32 %v139_v8, %v42_v3  ;;  %432 = vmatmul.bf16.vlgmr.msrb.gmra.mxu1 %v148_v6 }
  0x92   :  { %v145_v12 = vmax.f32 %v127_v9, 0.0  ;;  %v115_v14 = vpop.f32.mrf.mxu1 }
  0x93   :  { %v146_v13 = vmax.f32 %v140_v10, 0.0 }
  0x94   :  { %v149_v15 = vpack.c.bf16 %v145_v12, %v145_v12 }
  0x95   :  { %v150_v16 = vpack.c.bf16 %v146_v13, %v146_v13 }
  0x96   :  { %445 = vmatmul.bf16.vlgmr.msrb.gmra.mxu2 %v149_v15 }
  0x97   :  { %458 = vmatmul.bf16.vlgmr.msrb.gmra.mxu3 %v150_v16  ;;  %v128_v17 = vpop.f32.mrf.mxu2 }
  0x98   :  { %v141_v18 = vpop.f32.mrf.mxu3 }
 0x10c   :  { %v420_v23 = vpop.f32.mrf.mxu0 }
 0x10d   :  { %v421_v26 = vadd.f32 %v749_v24, %v420_v23 }
 0x10e   :  { %v433_v25 = vpop.f32.mrf.mxu1 }
 0x10f   :  { %v434_v28 = vadd.f32 %v433_v25, %v421_v26 }
 0x114   :  { %v422_v27 = vpop.f32.mrf.mxu0 }
 0x116   :  { %v435_v29 = vpop.f32.mrf.mxu1 }
 0x119   :  { %v446_v30 = vpop.f32.mrf.mxu2 }
 0x11a   :  { %v459_v31 = vpop.f32.mrf.mxu3  ;;  %v447_v32 = vadd.f32 %v446_v30, %v434_v28 }
 0x11c   :  { %v460_v33 = vadd.f32 %v459_v31, %v447_v32 }
 0x11e   :  { %v463_v34 = vmax.f32 %v460_v33, 0.0 }
 0x120   :  { %v464_v35 = vpack.c.bf16 %v463_v34, %v463_v34 }
 0x121   :  { %v448_v36 = vpop.f32.mrf.mxu2 }
 0x122   :  { %v461_v37 = vpop.f32.mrf.mxu3  ;;  %704 = vmatmul.msk.bf16.vlgmr.msra.gmra.mxu0 %vm501_vm1, %v464_v35 }
 0x19f   :  { %v514_v39 = vpop.f32.mrf.mxu0 }
 0x1a0   :  { %v515_v40 = vadd.f32 %v750_v38, %v514_v39 }
 0x1a2   :  { %v518_v41 = vpack.c.bf16 %v515_v40, %v515_v40 }
 0x1a4   :  { %519 = vst [vmem:[%s969_s7] sm:$0xf] %v518_v41 }
 0x1a7   :  { %v516_v42 = vpop.f32.mrf.mxu0 }

</bundles_post_ra>
